<compile_context>
chip_gen: v5e
topology: v5e:2x2
jax: 0.10.0
libtpu: 0.0.40
codegen_flags: <defaults>
</compile_context>

<pallas_src>
import jax
import jax.numpy as jnp
from jax.experimental import pallas as pl
from jax.experimental.pallas import tpu as pltpu


_VMEM_LIMIT = 48 * 1024 * 1024          # safe on v5e/v6e (128 MiB) and v7x (64 MiB)
_BLOCK_BUDGET = 6 * 1024 * 1024         # per-buffer target; x2 for double buffering


# ---------------------------------------------------------------------------
# small static helpers (trace-time Python only)
# ---------------------------------------------------------------------------
def _round_up(x, m):
    return (x + m - 1) // m * m


def _pick_tile(size, quantum, target):
    """Return (padded_size, tile).

    If the whole dim fits under `target`, use a single full-dim block (always
    layout-legal, no padding).  Otherwise pad to a multiple of `quantum`
    (sublane=8 / lane=128 rule) and use the largest multiple of `quantum`
    <= target that divides the padded size.
    """
    if size <= target:
        return size, size
    padded = _round_up(size, quantum)
    tile = quantum
    t = quantum
    while t <= target:
        if padded % t == 0:
            tile = t
        t += quantum
    return padded, tile


def _budget_target(inner_elems, itemsize, quantum, cap=512, budget=_BLOCK_BUDGET):
    """Largest tile (multiple of quantum, <= cap) s.t. tile*inner_elems fits budget."""
    t = budget // max(1, itemsize * inner_elems)
    return max(quantum, min(cap, (t // quantum) * quantum))


def _pad_dim(a, axis, new_size):
    if a.shape[axis] == new_size:
        return a
    pads = [(0, 0)] * a.ndim
    pads[axis] = (0, new_size - a.shape[axis])
    return jnp.pad(a, pads)


# ---------------------------------------------------------------------------
# kernels
# ---------------------------------------------------------------------------
def _mm_bias_kernel(x_ref, w_ref, b_ref, o_ref):
    # x: (tm, M)  w: (M, tn)  b: (1, tn)  o: (tm, tn)
    acc = jnp.dot(x_ref[...], w_ref[...], preferred_element_type=jnp.float32)
    o_ref[...] = (acc + b_ref[...]).astype(o_ref.dtype)


def _wt_x_bias_kernel(wt_ref, x_ref, bt_ref, o_ref):
    # wt: (tn, M)  x: (1, M, tc)  bt: (tn, 1)  o: (1, tn, tc)
    acc = jnp.dot(wt_ref[...], x_ref[0], preferred_element_type=jnp.float32)
    o_ref[0] = (acc + bt_ref[...]).astype(o_ref.dtype)


def _grouped_mm_bias_kernel(x_ref, w_ref, b_ref, o_ref):
    # x: (tb, Gb, M)  w: (Gb, M, N)  b: (Gb, 1, N)  o: (tb, Gb, N)
    # Gb is small (<= 32) by construction -> static unroll over the group block.
    for g in range(w_ref.shape[0]):
        acc = jnp.dot(x_ref[:, g, :], w_ref[g],
                      preferred_element_type=jnp.float32)          # (tb, N)
        o_ref[:, g, :] = (acc + b_ref[g]).astype(o_ref.dtype)


# ---------------------------------------------------------------------------
# groups == 1, channel-first:  einsum('bcm,mn->bcn') + bias
# ---------------------------------------------------------------------------
def _conv1d1x1_g1_cf(x_cf, W, bias):
    B, C, M = x_cf.shape
    N = W.shape[1]
    R = B * C
    itemsize = x_cf.dtype.itemsize

    row_target = _budget_target(M, itemsize, 8)
    n_target = _budget_target(M, itemsize, 128)
    Rp, tm = _pick_tile(R, 8, row_target)
    Np, tn = _pick_tile(N, 128, n_target)
    # TODO(synk): add a K grid axis with a VMEM f32 accumulator if cin (M) is
    # ever too large to keep resident per block.

    x2d = _pad_dim(x_cf.reshape(R, M), 0, Rp)
    Wp = _pad_dim(W, 1, Np)
    bp = _pad_dim(bias, 1, Np)

    out = pl.pallas_call(
        _mm_bias_kernel,
        out_shape=jax.ShapeDtypeStruct((Rp, Np), x_cf.dtype),
        grid=(Rp // tm, Np // tn),
        in_specs=[
            pl.BlockSpec((tm, M), lambda i, j: (i, 0)),
            pl.BlockSpec((M, tn), lambda i, j: (0, j)),   # independent of row axis
            pl.BlockSpec((1, tn), lambda i, j: (0, j)),
        ],
        out_specs=pl.BlockSpec((tm, tn), lambda i, j: (i, j)),
        compiler_params=pltpu.CompilerParams(
            dimension_semantics=("parallel", "parallel"),
            vmem_limit_bytes=_VMEM_LIMIT),
        cost_estimate=pl.CostEstimate(
            flops=2 * R * M * N,
            transcendentals=0,
            bytes_accessed=itemsize * (R * M + M * N + R * N + N)),
    )(x2d, Wp, bp)

    if Rp != R or Np != N:
        out = out[:R, :N]
    return out.reshape(B, C, N)


# ---------------------------------------------------------------------------
# groups == 1, channel-last:  einsum('bmc,mn->bnc') + bias.T
# (activation stays in its native layout; only the small weight is transposed)
# ---------------------------------------------------------------------------
def _conv1d1x1_g1_cl(x_cl, W, bias):
    B, M, C = x_cl.shape
    N = W.shape[1]
    itemsize = x_cl.dtype.itemsize

    c_target = _budget_target(M, itemsize, 128)
    n_target = _budget_target(M, itemsize, 8)
    Cp, tc = _pick_tile(C, 128, c_target)
    Np, tn = _pick_tile(N, 8, n_target)

    Wt = _pad_dim(W.T, 0, Np)            # (Np, M)   small weight transpose only
    bt = _pad_dim(bias.T, 0, Np)         # (Np, 1)
    xp = _pad_dim(x_cl, 2, Cp)

    out = pl.pallas_call(
        _wt_x_bias_kernel,
        out_shape=jax.ShapeDtypeStruct((B, Np, Cp), x_cl.dtype),
        grid=(B, Cp // tc, Np // tn),     # n innermost -> x block read once
        in_specs=[
            pl.BlockSpec((tn, M), lambda b, c, n: (n, 0)),
            pl.BlockSpec((1, M, tc), lambda b, c, n: (b, 0, c)),
            pl.BlockSpec((tn, 1), lambda b, c, n: (n, 0)),
        ],
        out_specs=pl.BlockSpec((1, tn, tc), lambda b, c, n: (b, n, c)),
        compiler_params=pltpu.CompilerParams(
            dimension_semantics=("parallel", "parallel", "parallel"),
            vmem_limit_bytes=_VMEM_LIMIT),
        cost_estimate=pl.CostEstimate(
            flops=2 * B * M * N * C,
            transcendentals=0,
            bytes_accessed=itemsize * (B * M * C + M * N + B * N * C + N)),
    )(Wt, xp, bt)

    if Np != N or Cp != C:
        out = out[:, :N, :C]
    return out


# ---------------------------------------------------------------------------
# groups > 1, channel-first:  einsum('bcm,cmn->bcn') + bias   (no HBM transpose)
# ---------------------------------------------------------------------------
def _conv1d1x1_grouped_cf(x_cf, W, bias):
    B, G, M = x_cf.shape
    N = W.shape[2]
    itemsize = x_cf.dtype.itemsize

    # group block: weight slab (Gb, M, N) a few MiB, unroll bounded at 32
    g_target = _budget_target(M * N, itemsize, 8, cap=32)
    Gp, Gb = _pick_tile(G, 8, g_target)
    b_target = _budget_target(Gb * M, itemsize, 8, cap=256)
    Bp, tb = _pick_tile(B, 8, b_target)
    # TODO(synk): also block M/N when a single group's (M, N) weight slab alone
    # exceeds a few MiB of VMEM.

    xp = _pad_dim(_pad_dim(x_cf, 1, Gp), 0, Bp)
    Wp = _pad_dim(W, 0, Gp)
    bp = _pad_dim(bias, 0, Gp).reshape(Gp, 1, N)

    out = pl.pallas_call(
        _grouped_mm_bias_kernel,
        out_shape=jax.ShapeDtypeStruct((Bp, Gp, N), x_cf.dtype),
        # groups outer / batch inner -> each weight slab is DMA'd exactly once
        grid=(Gp // Gb, Bp // tb),
        in_specs=[
            pl.BlockSpec((tb, Gb, M), lambda g, b: (b, g, 0)),
            pl.BlockSpec((Gb, M, N), lambda g, b: (g, 0, 0)),
            pl.BlockSpec((Gb, 1, N), lambda g, b: (g, 0, 0)),
        ],
        out_specs=pl.BlockSpec((tb, Gb, N), lambda g, b: (b, g, 0)),
        compiler_params=pltpu.CompilerParams(
            dimension_semantics=("parallel", "parallel"),
            vmem_limit_bytes=_VMEM_LIMIT),
        cost_estimate=pl.CostEstimate(
            flops=2 * B * G * M * N,
            transcendentals=0,
            bytes_accessed=itemsize * (B * G * M + G * M * N + B * G * N + G * N)),
    )(xp, Wp, bp)

    if Bp != B or Gp != G:
        out = out[:B, :G, :]
    return out


def _conv1d1x1_grouped_cl(x_cl, W, bias):
    # einsum('bmc,cmn->bnc') + bias.T
    # TODO(synk): transpose-free grouped channel-last kernel (the group axis
    # sits in the lane dimension here and needs an in-VMEM relayout); falling
    # back to HBM transposes around the optimized channel-first grouped kernel.
    out_cf = _conv1d1x1_grouped_cf(jnp.transpose(x_cl, (0, 2, 1)), W, bias)
    return jnp.transpose(out_cf, (0, 2, 1))


# ---------------------------------------------------------------------------
# public entry point (matches Conv1d1x1.forward)
# ---------------------------------------------------------------------------
def conv1d1x1(x, W, bias, groups, cformat="channel-first"):
    if groups == 1:
        N = W.shape[1]
        b = bias if bias is not None else jnp.zeros((1, N), x.dtype)
        if cformat == "channel-first":
            return _conv1d1x1_g1_cf(x, W, b)
        elif cformat == "channel-last":
            return _conv1d1x1_g1_cl(x, W, b)
        else:
            raise AssertionError(cformat)
    else:
        G, _, N = W.shape
        b = bias if bias is not None else jnp.zeros((G, N), x.dtype)
        if cformat == "channel-first":
            return _conv1d1x1_grouped_cf(x, W, b)
        elif cformat == "channel-last":
            return _conv1d1x1_grouped_cl(x, W, b)
        else:
            raise AssertionError(cformat)


if __name__ == "__main__":
    key = jax.random.PRNGKey(0)
    ks = jax.random.split(key, 8)

    B, C, M, N, G = 2, 8, 32, 16, 8        # batch, spatial/other, cin, cout, groups
    Cl = 10                                # trailing dim for channel-last g1 test

    # ----- groups == 1, channel-first -----
    x1 = jax.random.normal(ks[0], (B, C, M), dtype=jnp.float32)
    W1 = jax.random.normal(ks[1], (M, N), dtype=jnp.float32)
    b1 = 0.1 * jax.random.normal(ks[2], (1, N), dtype=jnp.float32)
    out1 = jax.block_until_ready(conv1d1x1(x1, W1, b1, groups=1))
    ref1 = jnp.einsum("bcm,mn->bcn", x1, W1) + b1

    # ----- groups == 1, channel-last -----
    x2 = jax.random.normal(ks[3], (B, M, Cl), dtype=jnp.float32)
    out2 = jax.block_until_ready(conv1d1x1(x2, W1, b1, groups=1, cformat="channel-last"))
    ref2 = jnp.einsum("bmc,mn->bnc", x2, W1) + b1.T

    # ----- groups > 1, channel-first -----
    xg = jax.random.normal(ks[4], (B, G, M), dtype=jnp.float32)
    Wg = jax.random.normal(ks[5], (G, M, N), dtype=jnp.float32)
    bg = 0.1 * jax.random.normal(ks[6], (G, N), dtype=jnp.float32)
    outg = jax.block_until_ready(conv1d1x1(xg, Wg, bg, groups=G))
    refg = jnp.einsum("bcm,cmn->bcn", xg, Wg) + bg

    # ----- groups > 1, channel-last -----
    xgl = jax.random.normal(ks[7], (B, M, G), dtype=jnp.float32)
    outgl = jax.block_until_ready(conv1d1x1(xgl, Wg, bg, groups=G, cformat="channel-last"))
    refgl = jnp.einsum("bmc,cmn->bnc", xgl, Wg) + bg.T

    assert out1.shape == ref1.shape and jnp.allclose(out1, ref1, atol=1e-4, rtol=1e-4)
    assert out2.shape == ref2.shape and jnp.allclose(out2, ref2, atol=1e-4, rtol=1e-4)
    assert outg.shape == refg.shape and jnp.allclose(outg, refg, atol=1e-4, rtol=1e-4)
    assert outgl.shape == refgl.shape and jnp.allclose(outgl, refgl, atol=1e-4, rtol=1e-4)
    print("KERNEL_OK")
</pallas_src>

<mosaic_0001>
module attributes {stable_mosaic.version = 11 : i64} {
  func.func @_mm_bias_kernel(%arg0: i32, %arg1: i32, %arg2: memref<16x32xf32, #tpu.memory_space<vmem>>, %arg3: memref<32x16xf32, #tpu.memory_space<vmem>>, %arg4: memref<1x16xf32, #tpu.memory_space<vmem>>, %arg5: memref<16x16xf32, #tpu.memory_space<vmem>>) attributes {dimension_semantics = [#tpu.dimension_semantics<parallel>, #tpu.dimension_semantics<parallel>], iteration_bounds = array<i64: 1, 1>, scalar_prefetch = 0 : i64, scratch_operands = 0 : i64, tpu.core_type = #tpu.core_type<tc>, window_params = [{transform_indices = @transform_0, window_bounds = array<i64: 16, 32>}, {transform_indices = @transform_1, window_bounds = array<i64: 32, 16>}, {transform_indices = @transform_2, window_bounds = array<i64: 1, 16>}, {transform_indices = @transform_3, window_bounds = array<i64: 16, 16>}]} {
    %c0 = arith.constant 0 : index
    %c0_0 = arith.constant 0 : index
    %0 = vector.load %arg2[%c0, %c0_0] : memref<16x32xf32, #tpu.memory_space<vmem>>, vector<16x32xf32>
    %c0_1 = arith.constant 0 : index
    %c0_2 = arith.constant 0 : index
    %1 = vector.load %arg3[%c0_1, %c0_2] : memref<32x16xf32, #tpu.memory_space<vmem>>, vector<32x16xf32>
    %cst = arith.constant dense<0.000000e+00> : vector<16x16xf32>
    %2 = tpu.matmul %0, %1, %cst {dimension_numbers = #tpu.dot_dimension_numbers<[1], [0], [0], [1], [0, 0, 1, 1], [], []>} : vector<16x32xf32>, vector<32x16xf32>, vector<16x16xf32> -> vector<16x16xf32>
    %c0_3 = arith.constant 0 : index
    %c0_4 = arith.constant 0 : index
    %3 = vector.load %arg4[%c0_3, %c0_4] : memref<1x16xf32, #tpu.memory_space<vmem>>, vector<1x16xf32>
    %4 = vector.broadcast %3 : vector<1x16xf32> to vector<16x16xf32>
    %5 = arith.addf %2, %4 : vector<16x16xf32>
    %c0_5 = arith.constant 0 : index
    %c0_6 = arith.constant 0 : index
    %6 = vector.load %arg5[%c0_5, %c0_6] : memref<16x16xf32, #tpu.memory_space<vmem>>, vector<16x16xf32>
    tpu.vector_store %arg5[%c0_5, %c0_6], %5 {strides = array<i32>} : memref<16x16xf32, #tpu.memory_space<vmem>>, vector<16x16xf32>,
    return
  }
  func.func @transform_0(%arg0: i32, %arg1: i32) -> (i32, i32) {
    %c0_i32 = arith.constant 0 : i32
    %c0_i32_0 = arith.constant 0 : i32
    return %arg0, %c0_i32 : i32, i32
  }
  func.func @transform_1(%arg0: i32, %arg1: i32) -> (i32, i32) {
    %c0_i32 = arith.constant 0 : i32
    %c0_i32_0 = arith.constant 0 : i32
    return %c0_i32, %arg1 : i32, i32
  }
  func.func @transform_2(%arg0: i32, %arg1: i32) -> (i32, i32) {
    %c0_i32 = arith.constant 0 : i32
    %c0_i32_0 = arith.constant 0 : i32
    return %c0_i32, %arg1 : i32, i32
  }
  func.func @transform_3(%arg0: i32, %arg1: i32) -> (i32, i32) {
    %c0_i32 = arith.constant 0 : i32
    return %arg0, %arg1 : i32, i32
  }
}

</mosaic_0001>

<bundles_post_ra>
// kernel: tpu_custom_call.1
= control target key start
LH: loop header
LB: loop body
LE: loop exit
PB: predicated region body
PF: predicated region fallthrough
CT: control target
= control target key end

     0   :  { %s159_s0 = inlined_call_operand.vmem [shape: f32[16,32], index: 0, kind: input, shape index: {}]   ;;  %s160_s1 = inlined_call_operand.vmem [shape: f32[32,16], index: 1, kind: input, shape index: {}]   ;;  %s161_s2 = inlined_call_operand.vmem [shape: f32[1,16], index: 2, kind: input, shape index: {}]   ;;  %s162_s3 = inlined_call_operand.hbm [shape: f32[16,16], index: 3, kind: output, shape index: {}]  }
   0x1   :  { %v20_v0 = vld [vmem:[%s160_s1 + $0x18] sm:$0xff]  ;;  %v19_v1 = vld [vmem:[%s160_s1 + $0x10] sm:$0xff]  ;;  %v18_v2 = vld [vmem:[%s160_s1 + $0x8] sm:$0xff] }
   0x2   :  { %44 = vmatpush.msra.mxu0 %v20_v0  ;;  %78 = vmatpush.msra.mxu1 %v20_v0 }
   0x3   :  { %8 = vsyncpa [#allocation3], 0  ;;  %v17_v3 = vld [vmem:[%s160_s1] sm:$0xff]  ;;  %vm25_vm0 = vcmask 261120   ;;  %v16_v5 = vld [vmem:[%s159_s0 + $0x8] sm:$0xff]  ;;  %s112_s1 = smov [#allocation2]  }
   0x4   :  { %45 = vmatpush.msra.mxu0 %v19_v1  ;;  %79 = vmatpush.msra.mxu1 %v19_v1  ;;  %v15_v4 = vld [vmem:[%s159_s0] sm:$0xff]  ;;  %s62_s26 = sshll.u32 %s112_s1, 4  ;;  %s64_s29 = sshll.u32 %s162_s3, 4  ;;  %vm55_vm1 = vcmask 130048   ;;  %s63_s26 = int_to_ptr.vmem [resolvable:$true] %s62_s26  ;;  %s65_s29 = int_to_ptr.hbm [resolvable:$true] %s64_s29 }
   0x5   :  { %v85_v6 = vld [vmem:[%s161_s2] ss:$0 sm:$0xff]  ;;  %s113_s0 = smov 128   ;;  %s114_s30 = smov 8  }
   0x6   :  { %46 = vmatpush.msra.mxu0 %v18_v2  ;;  %80 = vmatpush.msra.mxu1 %v18_v2 }
   0x8   :  { %47 = vmatpush.msra.mxu0 %v17_v3  ;;  %81 = vmatpush.msra.mxu1 %v17_v3 }
   0x9   :  { %76 = vmatmul.msk.f32.vlgmr.msra.gmra.mxu0 %vm25_vm0, %v15_v4  ;;  %77 = vmatmul.msk.f32.vlgmr.msra.gmra.mxu1 %vm25_vm0, %v16_v5 }
  0x86   :  { %v49_v7 = vpop.f32.mrf.mxu0  ;;  %v52_v8 = vpop.f32.mrf.mxu1 }
  0x87   :  { %v50_v9 = vadd.f32 %v85_v6, %v49_v7  ;;  %v53_v10 = vadd.f32 %v85_v6, %v52_v8 }
  0x89   :  { %56 = vst.msk [vmem:[#allocation2] sm:$0xff] %vm55_vm1, %v50_v9 }
  0x8a   :  { %57 = vst.msk [vmem:[#allocation2 + $0x8] sm:$0xff] %vm55_vm1, %v53_v10 }
  0x8b   :  { %70 = dma.vmem_to_hbm [thread:$0]  %s63_s26, 256, %s65_s29, [#allocation3], %s113_s0, %s113_s0, %s114_s30  }
  0x8c   :  { %110 = dma.done.wait [#allocation3], 256  }
  0x8d   :  { %111 = vsyncadd [#allocation3], 4294967040 }
  0x8e   :  { %75 = vsyncpa [#allocation3], 1 }

</bundles_post_ra>
